<compile_context>
chip_gen: v5e
topology: v5e:2x2
jax: 0.10.0
libtpu: 0.0.40
codegen_flags: <defaults>
</compile_context>

<pallas_src>
import functools
import math

import jax
import jax.numpy as jnp
import numpy as np
from jax.experimental import pallas as pl
from jax.experimental.pallas import tpu as pltpu


def _lcm(a, b):
    return a * b // math.gcd(a, b)


def _graph_builder_kernel(obs_ref, extra_ref, edge_tile_ref, x_ref, edge_ref, *,
                          input_dim, d_extra, node_num, fold):
    """One batch tile (bt_f folded rows == bt_f*fold original batch rows).

    obs_ref      : (bt_f, fold*node_num*input_dim)  native dtype, lane-dense
    extra_ref    : (1,    fold*node_num*out_dim)    f32 batch-invariant slab
    edge_tile_ref: (2,    bt_rows*E)                int32 batch-invariant pattern
    x_ref        : (bt_f, fold*node_num*out_dim)    f32, lane-dense
    edge_ref     : (2,    bt_rows*E)                int32
    """
    out_dim = input_dim + d_extra
    row_in = node_num * input_dim          # obs lanes per original batch row
    row_out = node_num * out_dim           # x   lanes per original batch row
    bt_rows = x_ref.shape[0] * fold        # original batch rows in this tile

    # (1) one dense full-tile store: the batch-invariant ego/other slab
    #     (obs slots hold zeros and are overwritten below).  extra_ref has a
    #     single sublane, so this broadcast is effectively a replicated layout.
    x_ref[...] = jnp.broadcast_to(extra_ref[...], x_ref.shape)

    # (2) scatter each (fold, node) obs chunk to its interleaved lane offset.
    #     Statically unrolled narrow ref->ref copies (proven Mosaic lowering);
    #     the dtype cast happens here in VMEM so obs is read from HBM in its
    #     native dtype.  Both HBM-facing DMAs stay fully lane-dense.
    for r in range(fold):
        for k in range(node_num):
            src = r * row_in + k * input_dim
            dst = r * row_out + k * out_dim
            x_ref[:, dst:dst + input_dim] = (
                obs_ref[:, src:src + input_dim].astype(jnp.float32))

    # (3) edges: batch-invariant per-tile pattern + scalar tile offset.
    edge_ref[...] = edge_tile_ref[...] + pl.program_id(0) * (bt_rows * node_num)


def _plan_tiles(batch, node_num, input_dim, out_dim, n_edges, batch_tile=None,
                vmem_budget_bytes=12 << 20, default_tile_rows=4096):
    """Pick fold factor + folded batch tile (lane-dense, VMEM-bounded blocks)."""
    # Fold factor f: reshape (B, N*dim) -> (B/f, f*N*dim) so both HBM-facing
    # last dims are multiples of 128 lanes (dense vst / dense DMA).
    f = _lcm(128 // math.gcd(node_num * input_dim, 128),
             128 // math.gcd(node_num * out_dim, 128))
    if f > 1 and batch % f != 0:
        f = 1                               # fallback: still correct, less dense
    bf_total = batch // f
    w_in = f * node_num * input_dim
    w_out = f * node_num * out_dim

    # Tile alignment: sublanes %8, edge-block lanes (bt_f*f*E) %128.
    lane_align = 128 // math.gcd(f * n_edges, 128)
    align = _lcm(8, lane_align)

    # Double-buffered VMEM bytes per folded row (obs in + x out + edge pattern
    # in + edges out with their 2->8 sublane padding).
    def _pad128(n):
        return -(-n // 128) * 128
    per_row = (2 * 4 * (_pad128(w_in) + _pad128(w_out))
               + 2 * 2 * 4 * 8 * (f * n_edges))

    if batch_tile is not None:
        bt_f = max(1, int(batch_tile) // f)
    else:
        bt_f = min(max(1, default_tile_rows // f),
                   max(1, vmem_budget_bytes // per_row))
        # v7x megacore: keep at least 2 "parallel" grid steps when the batch is
        # big enough that the extra per-step overhead is negligible on 1-TC chips.
        if batch >= 2048 and bt_f >= bf_total:
            bt_f = -(-bf_total // 2)

    if bt_f >= bf_total:
        bt_f = bf_total                     # full-extent block: always legal
    else:
        bt_f = min(bf_total, max(align, -(-bt_f // align) * align))
    num_tiles = -(-bf_total // bt_f)
    return f, bf_total, w_in, w_out, bt_f, num_tiles


def traffic_graph_builder(obs, ego_init, other_init, edge_index, input_dim=4,
                          batch_tile=None):
    """Pallas-TPU forward of TrafficGraphBuilder.

    Returns (x, edges):
      x     : (batch*node_num, input_dim + d_extra) float32
      edges : (2, batch*E) int32   (PyTorch uses int64; values < batch*node_num)
    """
    batch, obs_dim = obs.shape
    assert obs_dim % input_dim == 0
    node_num = obs_dim // input_dim
    d_extra = int(ego_init.shape[0])
    out_dim = input_dim + d_extra
    n_edges = int(edge_index.shape[1])
    assert batch * node_num < 2 ** 31      # int32 edge indices are sufficient

    f, bf_total, w_in, w_out, bt_f, num_tiles = _plan_tiles(
        batch, node_num, input_dim, out_dim, n_edges, batch_tile)
    bt_rows = bt_f * f

    # Free row-major reshape into the lane-dense folded layout (native dtype).
    obs_folded = obs.reshape(bf_total, w_in)

    # Batch-invariant ego/other slab laid out in the output's interleaved
    # lanes (zeros in the obs slots), tiled over the fold.
    ego = ego_init.astype(jnp.float32)
    other = other_init.astype(jnp.float32)
    node_extra = jnp.where(jnp.arange(node_num)[:, None] == 0,
                           ego[None, :], other[None, :])            # (N, d_extra)
    extra_one = jnp.concatenate(
        [jnp.zeros((node_num, input_dim), jnp.float32), node_extra],
        axis=1).reshape(1, node_num * out_dim)
    extra_slab = jnp.tile(extra_one, (1, f))                        # (1, w_out)

    # Batch-invariant per-tile edge pattern (constant block -> DMA'd once).
    edge_base = edge_index.astype(jnp.int32)                        # (2, E)
    local_off = jnp.repeat(
        jnp.arange(bt_rows, dtype=jnp.int32) * node_num, n_edges)   # (bt_rows*E,)
    edge_tile = jnp.tile(edge_base, (1, bt_rows)) + local_off[None, :]

    kernel = functools.partial(_graph_builder_kernel, input_dim=input_dim,
                               d_extra=d_extra, node_num=node_num, fold=f)

    bytes_accessed = (int(obs.size) * obs.dtype.itemsize            # obs read
                      + batch * node_num * out_dim * 4              # x written
                      + 2 * batch * n_edges * 4                     # edges written
                      + 2 * bt_rows * n_edges * 4                   # edge pattern (once)
                      + w_out * 4)                                  # extra slab (once)

    x2d, edges = pl.pallas_call(
        kernel,
        out_shape=(
            jax.ShapeDtypeStruct((bf_total, w_out), jnp.float32),
            jax.ShapeDtypeStruct((2, batch * n_edges), jnp.int32),
        ),
        grid=(num_tiles,),
        in_specs=[
            pl.BlockSpec((bt_f, w_in), lambda i: (i, 0)),              # obs (folded)
            pl.BlockSpec((1, w_out), lambda i: (0, 0)),                # extra slab
            pl.BlockSpec((2, bt_rows * n_edges), lambda i: (0, 0)),    # edge pattern
        ],
        out_specs=(
            pl.BlockSpec((bt_f, w_out), lambda i: (i, 0)),             # x (folded)
            pl.BlockSpec((2, bt_rows * n_edges), lambda i: (0, i)),    # edges
        ),
        compiler_params=pltpu.CompilerParams(
            dimension_semantics=("parallel",)),                        # v7x megacore
        cost_estimate=pl.CostEstimate(flops=0, transcendentals=0,
                                      bytes_accessed=int(bytes_accessed)),
    )(obs_folded, extra_slab, edge_tile)

    # Free (row-major-compatible) reshape to the PyTorch return shape.
    x = x2d.reshape(batch * node_num, out_dim)
    return x, edges


def _reference(obs, ego, other, edge_index, input_dim):
    """NumPy reference of the PyTorch forward semantics."""
    obs_np = np.asarray(jnp.asarray(obs, jnp.float32))
    batch, obs_dim = obs_np.shape
    node_num = obs_dim // input_dim
    d_extra = int(ego.shape[0])
    out_dim = input_dim + d_extra
    x = np.zeros((batch, node_num, out_dim), np.float32)
    x[:, :, :input_dim] = obs_np.reshape(batch, node_num, input_dim)
    x[:, 0, input_dim:] = np.asarray(ego, np.float32)
    x[:, 1:, input_dim:] = np.asarray(other, np.float32)
    edges = (np.asarray(edge_index, np.int64)[:, None, :]
             + (np.arange(batch, dtype=np.int64) * node_num)[None, :, None]
             ).reshape(2, -1)
    return x.reshape(batch * node_num, out_dim), edges


if __name__ == "__main__":
    key = jax.random.PRNGKey(0)

    # module buffers — deterministic defaults from __init__
    input_dim = 4
    ego_init = jnp.array([0.0, 1.0], dtype=jnp.float32)
    other_init = jnp.array([1.0, 0.0], dtype=jnp.float32)
    edge_index = jnp.array([[0, 0, 1, 2], [1, 2, 0, 0]], dtype=jnp.int32)

    cases = [
        # (batch, node_num, obs dtype, batch_tile)
        (128, 8, jnp.float32, 64),      # folded lane-dense blocks, grid of 2
        (192, 8, jnp.float32, 128),     # folded, ragged (partial) last tile
        (128, 8, jnp.bfloat16, None),   # native bf16 obs, cast inside kernel
        (36, 5, jnp.float32, None),     # fold fallback (f=1), full-extent blocks
    ]
    for ci, (batch, node_num, dt, bt) in enumerate(cases):
        key, sub = jax.random.split(key)
        obs = jax.random.normal(sub, (batch, node_num * input_dim),
                                dtype=jnp.float32).astype(dt)
        x, edges = traffic_graph_builder(obs, ego_init, other_init, edge_index,
                                         input_dim, batch_tile=bt)
        jax.block_until_ready((x, edges))

        x_exp, e_exp = _reference(obs, ego_init, other_init, edge_index, input_dim)
        assert x.shape == x_exp.shape and x.dtype == jnp.dtype(jnp.float32)
        assert np.allclose(np.asarray(x), x_exp), f"case {ci}: node feature mismatch"
        assert np.array_equal(np.asarray(edges), e_exp), f"case {ci}: edge index mismatch"

    print("KERNEL_OK")
</pallas_src>

<mosaic_0001>
module attributes {stable_mosaic.version = 11 : i64} {
  func.func @_graph_builder_kernel(%arg0: i32, %arg1: memref<8x256xf32, #tpu.memory_space<vmem>>, %arg2: memref<1x384xf32, #tpu.memory_space<vmem>>, %arg3: memref<2x256xi32, #tpu.memory_space<vmem>>, %arg4: memref<8x384xf32, #tpu.memory_space<vmem>>, %arg5: memref<2x256xi32, #tpu.memory_space<vmem>>) attributes {dimension_semantics = [#tpu.dimension_semantics<parallel>], iteration_bounds = array<i64: 2>, scalar_prefetch = 0 : i64, scratch_operands = 0 : i64, tpu.core_type = #tpu.core_type<tc>, window_params = [{transform_indices = @transform_0, window_bounds = array<i64: 8, 256>}, {pipeline_mode = #tpu.pipeline_mode<synchronous>, transform_indices = @transform_1, window_bounds = array<i64: 1, 384>}, {pipeline_mode = #tpu.pipeline_mode<synchronous>, transform_indices = @transform_2, window_bounds = array<i64: 2, 256>}, {transform_indices = @transform_3, window_bounds = array<i64: 8, 384>}, {transform_indices = @transform_4, window_bounds = array<i64: 2, 256>}]} {
    %c0 = arith.constant 0 : index
    %c0_0 = arith.constant 0 : index
    %0 = vector.load %arg2[%c0, %c0_0] : memref<1x384xf32, #tpu.memory_space<vmem>>, vector<1x384xf32>
    %1 = vector.shape_cast %0 : vector<1x384xf32> to vector<1x384xf32>
    %2 = vector.broadcast %1 : vector<1x384xf32> to vector<8x384xf32>
    %c0_1 = arith.constant 0 : index
    %c0_2 = arith.constant 0 : index
    %3 = vector.load %arg4[%c0_1, %c0_2] : memref<8x384xf32, #tpu.memory_space<vmem>>, vector<8x384xf32>
    tpu.vector_store %arg4[%c0_1, %c0_2], %2 {strides = array<i32>} : memref<8x384xf32, #tpu.memory_space<vmem>>, vector<8x384xf32>,
    %c0_3 = arith.constant 0 : index
    %c0_4 = arith.constant 0 : index
    %4 = vector.load %arg1[%c0_3, %c0_4] : memref<8x256xf32, #tpu.memory_space<vmem>>, vector<8x4xf32>
    %c0_5 = arith.constant 0 : index
    %c0_6 = arith.constant 0 : index
    %5 = vector.load %arg4[%c0_5, %c0_6] : memref<8x384xf32, #tpu.memory_space<vmem>>, vector<8x4xf32>
    tpu.vector_store %arg4[%c0_5, %c0_6], %4 {strides = array<i32>} : memref<8x384xf32, #tpu.memory_space<vmem>>, vector<8x4xf32>,
    %c0_7 = arith.constant 0 : index
    %c4 = arith.constant 4 : index
    %6 = vector.load %arg1[%c0_7, %c4] : memref<8x256xf32, #tpu.memory_space<vmem>>, vector<8x4xf32>
    %c0_8 = arith.constant 0 : index
    %c6 = arith.constant 6 : index
    %7 = vector.load %arg4[%c0_8, %c6] : memref<8x384xf32, #tpu.memory_space<vmem>>, vector<8x4xf32>
    tpu.vector_store %arg4[%c0_8, %c6], %6 {strides = array<i32>} : memref<8x384xf32, #tpu.memory_space<vmem>>, vector<8x4xf32>,
    %c0_9 = arith.constant 0 : index
    %c8 = arith.constant 8 : index
    %8 = vector.load %arg1[%c0_9, %c8] : memref<8x256xf32, #tpu.memory_space<vmem>>, vector<8x4xf32>
    %c0_10 = arith.constant 0 : index
    %c12 = arith.constant 12 : index
    %9 = vector.load %arg4[%c0_10, %c12] : memref<8x384xf32, #tpu.memory_space<vmem>>, vector<8x4xf32>
    tpu.vector_store %arg4[%c0_10, %c12], %8 {strides = array<i32>} : memref<8x384xf32, #tpu.memory_space<vmem>>, vector<8x4xf32>,
    %c0_11 = arith.constant 0 : index
    %c12_12 = arith.constant 12 : index
    %10 = vector.load %arg1[%c0_11, %c12_12] : memref<8x256xf32, #tpu.memory_space<vmem>>, vector<8x4xf32>
    %c0_13 = arith.constant 0 : index
    %c18 = arith.constant 18 : index
    %11 = vector.load %arg4[%c0_13, %c18] : memref<8x384xf32, #tpu.memory_space<vmem>>, vector<8x4xf32>
    tpu.vector_store %arg4[%c0_13, %c18], %10 {strides = array<i32>} : memref<8x384xf32, #tpu.memory_space<vmem>>, vector<8x4xf32>,
    %c0_14 = arith.constant 0 : index
    %c16 = arith.constant 16 : index
    %12 = vector.load %arg1[%c0_14, %c16] : memref<8x256xf32, #tpu.memory_space<vmem>>, vector<8x4xf32>
    %c0_15 = arith.constant 0 : index
    %c24 = arith.constant 24 : index
    %13 = vector.load %arg4[%c0_15, %c24] : memref<8x384xf32, #tpu.memory_space<vmem>>, vector<8x4xf32>
    tpu.vector_store %arg4[%c0_15, %c24], %12 {strides = array<i32>} : memref<8x384xf32, #tpu.memory_space<vmem>>, vector<8x4xf32>,
    %c0_16 = arith.constant 0 : index
    %c20 = arith.constant 20 : index
    %14 = vector.load %arg1[%c0_16, %c20] : memref<8x256xf32, #tpu.memory_space<vmem>>, vector<8x4xf32>
    %c0_17 = arith.constant 0 : index
    %c30 = arith.constant 30 : index
    %15 = vector.load %arg4[%c0_17, %c30] : memref<8x384xf32, #tpu.memory_space<vmem>>, vector<8x4xf32>
    tpu.vector_store %arg4[%c0_17, %c30], %14 {strides = array<i32>} : memref<8x384xf32, #tpu.memory_space<vmem>>, vector<8x4xf32>,
    %c0_18 = arith.constant 0 : index
    %c24_19 = arith.constant 24 : index
    %16 = vector.load %arg1[%c0_18, %c24_19] : memref<8x256xf32, #tpu.memory_space<vmem>>, vector<8x4xf32>
    %c0_20 = arith.constant 0 : index
    %c36 = arith.constant 36 : index
    %17 = vector.load %arg4[%c0_20, %c36] : memref<8x384xf32, #tpu.memory_space<vmem>>, vector<8x4xf32>
    tpu.vector_store %arg4[%c0_20, %c36], %16 {strides = array<i32>} : memref<8x384xf32, #tpu.memory_space<vmem>>, vector<8x4xf32>,
    %c0_21 = arith.constant 0 : index
    %c28 = arith.constant 28 : index
    %18 = vector.load %arg1[%c0_21, %c28] : memref<8x256xf32, #tpu.memory_space<vmem>>, vector<8x4xf32>
    %c0_22 = arith.constant 0 : index
    %c42 = arith.constant 42 : index
    %19 = vector.load %arg4[%c0_22, %c42] : memref<8x384xf32, #tpu.memory_space<vmem>>, vector<8x4xf32>
    tpu.vector_store %arg4[%c0_22, %c42], %18 {strides = array<i32>} : memref<8x384xf32, #tpu.memory_space<vmem>>, vector<8x4xf32>,
    %c0_23 = arith.constant 0 : index
    %c32 = arith.constant 32 : index
    %20 = vector.load %arg1[%c0_23, %c32] : memref<8x256xf32, #tpu.memory_space<vmem>>, vector<8x4xf32>
    %c0_24 = arith.constant 0 : index
    %c48 = arith.constant 48 : index
    %21 = vector.load %arg4[%c0_24, %c48] : memref<8x384xf32, #tpu.memory_space<vmem>>, vector<8x4xf32>
    tpu.vector_store %arg4[%c0_24, %c48], %20 {strides = array<i32>} : memref<8x384xf32, #tpu.memory_space<vmem>>, vector<8x4xf32>,
    %c0_25 = arith.constant 0 : index
    %c36_26 = arith.constant 36 : index
    %22 = vector.load %arg1[%c0_25, %c36_26] : memref<8x256xf32, #tpu.memory_space<vmem>>, vector<8x4xf32>
    %c0_27 = arith.constant 0 : index
    %c54 = arith.constant 54 : index
    %23 = vector.load %arg4[%c0_27, %c54] : memref<8x384xf32, #tpu.memory_space<vmem>>, vector<8x4xf32>
    tpu.vector_store %arg4[%c0_27, %c54], %22 {strides = array<i32>} : memref<8x384xf32, #tpu.memory_space<vmem>>, vector<8x4xf32>,
    %c0_28 = arith.constant 0 : index
    %c40 = arith.constant 40 : index
    %24 = vector.load %arg1[%c0_28, %c40] : memref<8x256xf32, #tpu.memory_space<vmem>>, vector<8x4xf32>
    %c0_29 = arith.constant 0 : index
    %c60 = arith.constant 60 : index
    %25 = vector.load %arg4[%c0_29, %c60] : memref<8x384xf32, #tpu.memory_space<vmem>>, vector<8x4xf32>
    tpu.vector_store %arg4[%c0_29, %c60], %24 {strides = array<i32>} : memref<8x384xf32, #tpu.memory_space<vmem>>, vector<8x4xf32>,
    %c0_30 = arith.constant 0 : index
    %c44 = arith.constant 44 : index
    %26 = vector.load %arg1[%c0_30, %c44] : memref<8x256xf32, #tpu.memory_space<vmem>>, vector<8x4xf32>
    %c0_31 = arith.constant 0 : index
    %c66 = arith.constant 66 : index
    %27 = vector.load %arg4[%c0_31, %c66] : memref<8x384xf32, #tpu.memory_space<vmem>>, vector<8x4xf32>
    tpu.vector_store %arg4[%c0_31, %c66], %26 {strides = array<i32>} : memref<8x384xf32, #tpu.memory_space<vmem>>, vector<8x4xf32>,
    %c0_32 = arith.constant 0 : index
    %c48_33 = arith.constant 48 : index
    %28 = vector.load %arg1[%c0_32, %c48_33] : memref<8x256xf32, #tpu.memory_space<vmem>>, vector<8x4xf32>
    %c0_34 = arith.constant 0 : index
    %c72 = arith.constant 72 : index
    %29 = vector.load %arg4[%c0_34, %c72] : memref<8x384xf32, #tpu.memory_space<vmem>>, vector<8x4xf32>
    tpu.vector_store %arg4[%c0_34, %c72], %28 {strides = array<i32>} : memref<8x384xf32, #tpu.memory_space<vmem>>, vector<8x4xf32>,
    %c0_35 = arith.constant 0 : index
    %c52 = arith.constant 52 : index
    %30 = vector.load %arg1[%c0_35, %c52] : memref<8x256xf32, #tpu.memory_space<vmem>>, vector<8x4xf32>
    %c0_36 = arith.constant 0 : index
    %c78 = arith.constant 78 : index
    %31 = vector.load %arg4[%c0_36, %c78] : memref<8x384xf32, #tpu.memory_space<vmem>>, vector<8x4xf32>
    tpu.vector_store %arg4[%c0_36, %c78], %30 {strides = array<i32>} : memref<8x384xf32, #tpu.memory_space<vmem>>, vector<8x4xf32>,
    %c0_37 = arith.constant 0 : index
    %c56 = arith.constant 56 : index
    %32 = vector.load %arg1[%c0_37, %c56] : memref<8x256xf32, #tpu.memory_space<vmem>>, vector<8x4xf32>
    %c0_38 = arith.constant 0 : index
    %c84 = arith.constant 84 : index
    %33 = vector.load %arg4[%c0_38, %c84] : memref<8x384xf32, #tpu.memory_space<vmem>>, vector<8x4xf32>
    tpu.vector_store %arg4[%c0_38, %c84], %32 {strides = array<i32>} : memref<8x384xf32, #tpu.memory_space<vmem>>, vector<8x4xf32>,
    %c0_39 = arith.constant 0 : index
    %c60_40 = arith.constant 60 : index
    %34 = vector.load %arg1[%c0_39, %c60_40] : memref<8x256xf32, #tpu.memory_space<vmem>>, vector<8x4xf32>
    %c0_41 = arith.constant 0 : index
    %c90 = arith.constant 90 : index
    %35 = vector.load %arg4[%c0_41, %c90] : memref<8x384xf32, #tpu.memory_space<vmem>>, vector<8x4xf32>
    tpu.vector_store %arg4[%c0_41, %c90], %34 {strides = array<i32>} : memref<8x384xf32, #tpu.memory_space<vmem>>, vector<8x4xf32>,
    %c0_42 = arith.constant 0 : index
    %c64 = arith.constant 64 : index
    %36 = vector.load %arg1[%c0_42, %c64] : memref<8x256xf32, #tpu.memory_space<vmem>>, vector<8x4xf32>
    %c0_43 = arith.constant 0 : index
    %c96 = arith.constant 96 : index
    %37 = vector.load %arg4[%c0_43, %c96] : memref<8x384xf32, #tpu.memory_space<vmem>>, vector<8x4xf32>
    tpu.vector_store %arg4[%c0_43, %c96], %36 {strides = array<i32>} : memref<8x384xf32, #tpu.memory_space<vmem>>, vector<8x4xf32>,
    %c0_44 = arith.constant 0 : index
    %c68 = arith.constant 68 : index
    %38 = vector.load %arg1[%c0_44, %c68] : memref<8x256xf32, #tpu.memory_space<vmem>>, vector<8x4xf32>
    %c0_45 = arith.constant 0 : index
    %c102 = arith.constant 102 : index
    %39 = vector.load %arg4[%c0_45, %c102] : memref<8x384xf32, #tpu.memory_space<vmem>>, vector<8x4xf32>
    tpu.vector_store %arg4[%c0_45, %c102], %38 {strides = array<i32>} : memref<8x384xf32, #tpu.memory_space<vmem>>, vector<8x4xf32>,
    %c0_46 = arith.constant 0 : index
    %c72_47 = arith.constant 72 : index
    %40 = vector.load %arg1[%c0_46, %c72_47] : memref<8x256xf32, #tpu.memory_space<vmem>>, vector<8x4xf32>
    %c0_48 = arith.constant 0 : index
    %c108 = arith.constant 108 : index
    %41 = vector.load %arg4[%c0_48, %c108] : memref<8x384xf32, #tpu.memory_space<vmem>>, vector<8x4xf32>
    tpu.vector_store %arg4[%c0_48, %c108], %40 {strides = array<i32>} : memref<8x384xf32, #tpu.memory_space<vmem>>, vector<8x4xf32>,
    %c0_49 = arith.constant 0 : index
    %c76 = arith.constant 76 : index
    %42 = vector.load %arg1[%c0_49, %c76] : memref<8x256xf32, #tpu.memory_space<vmem>>, vector<8x4xf32>
    %c0_50 = arith.constant 0 : index
    %c114 = arith.constant 114 : index
    %43 = vector.load %arg4[%c0_50, %c114] : memref<8x384xf32, #tpu.memory_space<vmem>>, vector<8x4xf32>
    tpu.vector_store %arg4[%c0_50, %c114], %42 {strides = array<i32>} : memref<8x384xf32, #tpu.memory_space<vmem>>, vector<8x4xf32>,
    %c0_51 = arith.constant 0 : index
    %c80 = arith.constant 80 : index
    %44 = vector.load %arg1[%c0_51, %c80] : memref<8x256xf32, #tpu.memory_space<vmem>>, vector<8x4xf32>
    %c0_52 = arith.constant 0 : index
    %c120 = arith.constant 120 : index
    %45 = vector.load %arg4[%c0_52, %c120] : memref<8x384xf32, #tpu.memory_space<vmem>>, vector<8x4xf32>
    tpu.vector_store %arg4[%c0_52, %c120], %44 {strides = array<i32>} : memref<8x384xf32, #tpu.memory_space<vmem>>, vector<8x4xf32>,
    %c0_53 = arith.constant 0 : index
    %c84_54 = arith.constant 84 : index
    %46 = vector.load %arg1[%c0_53, %c84_54] : memref<8x256xf32, #tpu.memory_space<vmem>>, vector<8x4xf32>
    %c0_55 = arith.constant 0 : index
    %c126 = arith.constant 126 : index
    %47 = vector.load %arg4[%c0_55, %c126] : memref<8x384xf32, #tpu.memory_space<vmem>>, vector<8x4xf32>
    tpu.vector_store %arg4[%c0_55, %c126], %46 {strides = array<i32>} : memref<8x384xf32, #tpu.memory_space<vmem>>, vector<8x4xf32>,
    %c0_56 = arith.constant 0 : index
    %c88 = arith.constant 88 : index
    %48 = vector.load %arg1[%c0_56, %c88] : memref<8x256xf32, #tpu.memory_space<vmem>>, vector<8x4xf32>
    %c0_57 = arith.constant 0 : index
    %c132 = arith.constant 132 : index
    %49 = vector.load %arg4[%c0_57, %c132] : memref<8x384xf32, #tpu.memory_space<vmem>>, vector<8x4xf32>
    tpu.vector_store %arg4[%c0_57, %c132], %48 {strides = array<i32>} : memref<8x384xf32, #tpu.memory_space<vmem>>, vector<8x4xf32>,
    %c0_58 = arith.constant 0 : index
    %c92 = arith.constant 92 : index
    %50 = vector.load %arg1[%c0_58, %c92] : memref<8x256xf32, #tpu.memory_space<vmem>>, vector<8x4xf32>
    %c0_59 = arith.constant 0 : index
    %c138 = arith.constant 138 : index
    %51 = vector.load %arg4[%c0_59, %c138] : memref<8x384xf32, #tpu.memory_space<vmem>>, vector<8x4xf32>
    tpu.vector_store %arg4[%c0_59, %c138], %50 {strides = array<i32>} : memref<8x384xf32, #tpu.memory_space<vmem>>, vector<8x4xf32>,
    %c0_60 = arith.constant 0 : index
    %c96_61 = arith.constant 96 : index
    %52 = vector.load %arg1[%c0_60, %c96_61] : memref<8x256xf32, #tpu.memory_space<vmem>>, vector<8x4xf32>
    %c0_62 = arith.constant 0 : index
    %c144 = arith.constant 144 : index
    %53 = vector.load %arg4[%c0_62, %c144] : memref<8x384xf32, #tpu.memory_space<vmem>>, vector<8x4xf32>
    tpu.vector_store %arg4[%c0_62, %c144], %52 {strides = array<i32>} : memref<8x384xf32, #tpu.memory_space<vmem>>, vector<8x4xf32>,
    %c0_63 = arith.constant 0 : index
    %c100 = arith.constant 100 : index
    %54 = vector.load %arg1[%c0_63, %c100] : memref<8x256xf32, #tpu.memory_space<vmem>>, vector<8x4xf32>
    %c0_64 = arith.constant 0 : index
    %c150 = arith.constant 150 : index
    %55 = vector.load %arg4[%c0_64, %c150] : memref<8x384xf32, #tpu.memory_space<vmem>>, vector<8x4xf32>
    tpu.vector_store %arg4[%c0_64, %c150], %54 {strides = array<i32>} : memref<8x384xf32, #tpu.memory_space<vmem>>, vector<8x4xf32>,
    %c0_65 = arith.constant 0 : index
    %c104 = arith.constant 104 : index
    %56 = vector.load %arg1[%c0_65, %c104] : memref<8x256xf32, #tpu.memory_space<vmem>>, vector<8x4xf32>
    %c0_66 = arith.constant 0 : index
    %c156 = arith.constant 156 : index
    %57 = vector.load %arg4[%c0_66, %c156] : memref<8x384xf32, #tpu.memory_space<vmem>>, vector<8x4xf32>
    tpu.vector_store %arg4[%c0_66, %c156], %56 {strides = array<i32>} : memref<8x384xf32, #tpu.memory_space<vmem>>, vector<8x4xf32>,
    %c0_67 = arith.constant 0 : index
    %c108_68 = arith.constant 108 : index
    %58 = vector.load %arg1[%c0_67, %c108_68] : memref<8x256xf32, #tpu.memory_space<vmem>>, vector<8x4xf32>
    %c0_69 = arith.constant 0 : index
    %c162 = arith.constant 162 : index
    %59 = vector.load %arg4[%c0_69, %c162] : memref<8x384xf32, #tpu.memory_space<vmem>>, vector<8x4xf32>
    tpu.vector_store %arg4[%c0_69, %c162], %58 {strides = array<i32>} : memref<8x384xf32, #tpu.memory_space<vmem>>, vector<8x4xf32>,
    %c0_70 = arith.constant 0 : index
    %c112 = arith.constant 112 : index
    %60 = vector.load %arg1[%c0_70, %c112] : memref<8x256xf32, #tpu.memory_space<vmem>>, vector<8x4xf32>
    %c0_71 = arith.constant 0 : index
    %c168 = arith.constant 168 : index
    %61 = vector.load %arg4[%c0_71, %c168] : memref<8x384xf32, #tpu.memory_space<vmem>>, vector<8x4xf32>
    tpu.vector_store %arg4[%c0_71, %c168], %60 {strides = array<i32>} : memref<8x384xf32, #tpu.memory_space<vmem>>, vector<8x4xf32>,
    %c0_72 = arith.constant 0 : index
    %c116 = arith.constant 116 : index
    %62 = vector.load %arg1[%c0_72, %c116] : memref<8x256xf32, #tpu.memory_space<vmem>>, vector<8x4xf32>
    %c0_73 = arith.constant 0 : index
    %c174 = arith.constant 174 : index
    %63 = vector.load %arg4[%c0_73, %c174] : memref<8x384xf32, #tpu.memory_space<vmem>>, vector<8x4xf32>
    tpu.vector_store %arg4[%c0_73, %c174], %62 {strides = array<i32>} : memref<8x384xf32, #tpu.memory_space<vmem>>, vector<8x4xf32>,
    %c0_74 = arith.constant 0 : index
    %c120_75 = arith.constant 120 : index
    %64 = vector.load %arg1[%c0_74, %c120_75] : memref<8x256xf32, #tpu.memory_space<vmem>>, vector<8x4xf32>
    %c0_76 = arith.constant 0 : index
    %c180 = arith.constant 180 : index
    %65 = vector.load %arg4[%c0_76, %c180] : memref<8x384xf32, #tpu.memory_space<vmem>>, vector<8x4xf32>
    tpu.vector_store %arg4[%c0_76, %c180], %64 {strides = array<i32>} : memref<8x384xf32, #tpu.memory_space<vmem>>, vector<8x4xf32>,
    %c0_77 = arith.constant 0 : index
    %c124 = arith.constant 124 : index
    %66 = vector.load %arg1[%c0_77, %c124] : memref<8x256xf32, #tpu.memory_space<vmem>>, vector<8x4xf32>
    %c0_78 = arith.constant 0 : index
    %c186 = arith.constant 186 : index
    %67 = vector.load %arg4[%c0_78, %c186] : memref<8x384xf32, #tpu.memory_space<vmem>>, vector<8x4xf32>
    tpu.vector_store %arg4[%c0_78, %c186], %66 {strides = array<i32>} : memref<8x384xf32, #tpu.memory_space<vmem>>, vector<8x4xf32>,
    %c0_79 = arith.constant 0 : index
    %c128 = arith.constant 128 : index
    %68 = vector.load %arg1[%c0_79, %c128] : memref<8x256xf32, #tpu.memory_space<vmem>>, vector<8x4xf32>
    %c0_80 = arith.constant 0 : index
    %c192 = arith.constant 192 : index
    %69 = vector.load %arg4[%c0_80, %c192] : memref<8x384xf32, #tpu.memory_space<vmem>>, vector<8x4xf32>
    tpu.vector_store %arg4[%c0_80, %c192], %68 {strides = array<i32>} : memref<8x384xf32, #tpu.memory_space<vmem>>, vector<8x4xf32>,
    %c0_81 = arith.constant 0 : index
    %c132_82 = arith.constant 132 : index
    %70 = vector.load %arg1[%c0_81, %c132_82] : memref<8x256xf32, #tpu.memory_space<vmem>>, vector<8x4xf32>
    %c0_83 = arith.constant 0 : index
    %c198 = arith.constant 198 : index
    %71 = vector.load %arg4[%c0_83, %c198] : memref<8x384xf32, #tpu.memory_space<vmem>>, vector<8x4xf32>
    tpu.vector_store %arg4[%c0_83, %c198], %70 {strides = array<i32>} : memref<8x384xf32, #tpu.memory_space<vmem>>, vector<8x4xf32>,
    %c0_84 = arith.constant 0 : index
    %c136 = arith.constant 136 : index
    %72 = vector.load %arg1[%c0_84, %c136] : memref<8x256xf32, #tpu.memory_space<vmem>>, vector<8x4xf32>
    %c0_85 = arith.constant 0 : index
    %c204 = arith.constant 204 : index
    %73 = vector.load %arg4[%c0_85, %c204] : memref<8x384xf32, #tpu.memory_space<vmem>>, vector<8x4xf32>
    tpu.vector_store %arg4[%c0_85, %c204], %72 {strides = array<i32>} : memref<8x384xf32, #tpu.memory_space<vmem>>, vector<8x4xf32>,
    %c0_86 = arith.constant 0 : index
    %c140 = arith.constant 140 : index
    %74 = vector.load %arg1[%c0_86, %c140] : memref<8x256xf32, #tpu.memory_space<vmem>>, vector<8x4xf32>
    %c0_87 = arith.constant 0 : index
    %c210 = arith.constant 210 : index
    %75 = vector.load %arg4[%c0_87, %c210] : memref<8x384xf32, #tpu.memory_space<vmem>>, vector<8x4xf32>
    tpu.vector_store %arg4[%c0_87, %c210], %74 {strides = array<i32>} : memref<8x384xf32, #tpu.memory_space<vmem>>, vector<8x4xf32>,
    %c0_88 = arith.constant 0 : index
    %c144_89 = arith.constant 144 : index
    %76 = vector.load %arg1[%c0_88, %c144_89] : memref<8x256xf32, #tpu.memory_space<vmem>>, vector<8x4xf32>
    %c0_90 = arith.constant 0 : index
    %c216 = arith.constant 216 : index
    %77 = vector.load %arg4[%c0_90, %c216] : memref<8x384xf32, #tpu.memory_space<vmem>>, vector<8x4xf32>
    tpu.vector_store %arg4[%c0_90, %c216], %76 {strides = array<i32>} : memref<8x384xf32, #tpu.memory_space<vmem>>, vector<8x4xf32>,
    %c0_91 = arith.constant 0 : index
    %c148 = arith.constant 148 : index
    %78 = vector.load %arg1[%c0_91, %c148] : memref<8x256xf32, #tpu.memory_space<vmem>>, vector<8x4xf32>
    %c0_92 = arith.constant 0 : index
    %c222 = arith.constant 222 : index
    %79 = vector.load %arg4[%c0_92, %c222] : memref<8x384xf32, #tpu.memory_space<vmem>>, vector<8x4xf32>
    tpu.vector_store %arg4[%c0_92, %c222], %78 {strides = array<i32>} : memref<8x384xf32, #tpu.memory_space<vmem>>, vector<8x4xf32>,
    %c0_93 = arith.constant 0 : index
    %c152 = arith.constant 152 : index
    %80 = vector.load %arg1[%c0_93, %c152] : memref<8x256xf32, #tpu.memory_space<vmem>>, vector<8x4xf32>
    %c0_94 = arith.constant 0 : index
    %c228 = arith.constant 228 : index
    %81 = vector.load %arg4[%c0_94, %c228] : memref<8x384xf32, #tpu.memory_space<vmem>>, vector<8x4xf32>
    tpu.vector_store %arg4[%c0_94, %c228], %80 {strides = array<i32>} : memref<8x384xf32, #tpu.memory_space<vmem>>, vector<8x4xf32>,
    %c0_95 = arith.constant 0 : index
    %c156_96 = arith.constant 156 : index
    %82 = vector.load %arg1[%c0_95, %c156_96] : memref<8x256xf32, #tpu.memory_space<vmem>>, vector<8x4xf32>
    %c0_97 = arith.constant 0 : index
    %c234 = arith.constant 234 : index
    %83 = vector.load %arg4[%c0_97, %c234] : memref<8x384xf32, #tpu.memory_space<vmem>>, vector<8x4xf32>
    tpu.vector_store %arg4[%c0_97, %c234], %82 {strides = array<i32>} : memref<8x384xf32, #tpu.memory_space<vmem>>, vector<8x4xf32>,
    %c0_98 = arith.constant 0 : index
    %c160 = arith.constant 160 : index
    %84 = vector.load %arg1[%c0_98, %c160] : memref<8x256xf32, #tpu.memory_space<vmem>>, vector<8x4xf32>
    %c0_99 = arith.constant 0 : index
    %c240 = arith.constant 240 : index
    %85 = vector.load %arg4[%c0_99, %c240] : memref<8x384xf32, #tpu.memory_space<vmem>>, vector<8x4xf32>
    tpu.vector_store %arg4[%c0_99, %c240], %84 {strides = array<i32>} : memref<8x384xf32, #tpu.memory_space<vmem>>, vector<8x4xf32>,
    %c0_100 = arith.constant 0 : index
    %c164 = arith.constant 164 : index
    %86 = vector.load %arg1[%c0_100, %c164] : memref<8x256xf32, #tpu.memory_space<vmem>>, vector<8x4xf32>
    %c0_101 = arith.constant 0 : index
    %c246 = arith.constant 246 : index
    %87 = vector.load %arg4[%c0_101, %c246] : memref<8x384xf32, #tpu.memory_space<vmem>>, vector<8x4xf32>
    tpu.vector_store %arg4[%c0_101, %c246], %86 {strides = array<i32>} : memref<8x384xf32, #tpu.memory_space<vmem>>, vector<8x4xf32>,
    %c0_102 = arith.constant 0 : index
    %c168_103 = arith.constant 168 : index
    %88 = vector.load %arg1[%c0_102, %c168_103] : memref<8x256xf32, #tpu.memory_space<vmem>>, vector<8x4xf32>
    %c0_104 = arith.constant 0 : index
    %c252 = arith.constant 252 : index
    %89 = vector.load %arg4[%c0_104, %c252] : memref<8x384xf32, #tpu.memory_space<vmem>>, vector<8x4xf32>
    tpu.vector_store %arg4[%c0_104, %c252], %88 {strides = array<i32>} : memref<8x384xf32, #tpu.memory_space<vmem>>, vector<8x4xf32>,
    %c0_105 = arith.constant 0 : index
    %c172 = arith.constant 172 : index
    %90 = vector.load %arg1[%c0_105, %c172] : memref<8x256xf32, #tpu.memory_space<vmem>>, vector<8x4xf32>
    %c0_106 = arith.constant 0 : index
    %c258 = arith.constant 258 : index
    %91 = vector.load %arg4[%c0_106, %c258] : memref<8x384xf32, #tpu.memory_space<vmem>>, vector<8x4xf32>
    tpu.vector_store %arg4[%c0_106, %c258], %90 {strides = array<i32>} : memref<8x384xf32, #tpu.memory_space<vmem>>, vector<8x4xf32>,
    %c0_107 = arith.constant 0 : index
    %c176 = arith.constant 176 : index
    %92 = vector.load %arg1[%c0_107, %c176] : memref<8x256xf32, #tpu.memory_space<vmem>>, vector<8x4xf32>
    %c0_108 = arith.constant 0 : index
    %c264 = arith.constant 264 : index
    %93 = vector.load %arg4[%c0_108, %c264] : memref<8x384xf32, #tpu.memory_space<vmem>>, vector<8x4xf32>
    tpu.vector_store %arg4[%c0_108, %c264], %92 {strides = array<i32>} : memref<8x384xf32, #tpu.memory_space<vmem>>, vector<8x4xf32>,
    %c0_109 = arith.constant 0 : index
    %c180_110 = arith.constant 180 : index
    %94 = vector.load %arg1[%c0_109, %c180_110] : memref<8x256xf32, #tpu.memory_space<vmem>>, vector<8x4xf32>
    %c0_111 = arith.constant 0 : index
    %c270 = arith.constant 270 : index
    %95 = vector.load %arg4[%c0_111, %c270] : memref<8x384xf32, #tpu.memory_space<vmem>>, vector<8x4xf32>
    tpu.vector_store %arg4[%c0_111, %c270], %94 {strides = array<i32>} : memref<8x384xf32, #tpu.memory_space<vmem>>, vector<8x4xf32>,
    %c0_112 = arith.constant 0 : index
    %c184 = arith.constant 184 : index
    %96 = vector.load %arg1[%c0_112, %c184] : memref<8x256xf32, #tpu.memory_space<vmem>>, vector<8x4xf32>
    %c0_113 = arith.constant 0 : index
    %c276 = arith.constant 276 : index
    %97 = vector.load %arg4[%c0_113, %c276] : memref<8x384xf32, #tpu.memory_space<vmem>>, vector<8x4xf32>
    tpu.vector_store %arg4[%c0_113, %c276], %96 {strides = array<i32>} : memref<8x384xf32, #tpu.memory_space<vmem>>, vector<8x4xf32>,
    %c0_114 = arith.constant 0 : index
    %c188 = arith.constant 188 : index
    %98 = vector.load %arg1[%c0_114, %c188] : memref<8x256xf32, #tpu.memory_space<vmem>>, vector<8x4xf32>
    %c0_115 = arith.constant 0 : index
    %c282 = arith.constant 282 : index
    %99 = vector.load %arg4[%c0_115, %c282] : memref<8x384xf32, #tpu.memory_space<vmem>>, vector<8x4xf32>
    tpu.vector_store %arg4[%c0_115, %c282], %98 {strides = array<i32>} : memref<8x384xf32, #tpu.memory_space<vmem>>, vector<8x4xf32>,
    %c0_116 = arith.constant 0 : index
    %c192_117 = arith.constant 192 : index
    %100 = vector.load %arg1[%c0_116, %c192_117] : memref<8x256xf32, #tpu.memory_space<vmem>>, vector<8x4xf32>
    %c0_118 = arith.constant 0 : index
    %c288 = arith.constant 288 : index
    %101 = vector.load %arg4[%c0_118, %c288] : memref<8x384xf32, #tpu.memory_space<vmem>>, vector<8x4xf32>
    tpu.vector_store %arg4[%c0_118, %c288], %100 {strides = array<i32>} : memref<8x384xf32, #tpu.memory_space<vmem>>, vector<8x4xf32>,
    %c0_119 = arith.constant 0 : index
    %c196 = arith.constant 196 : index
    %102 = vector.load %arg1[%c0_119, %c196] : memref<8x256xf32, #tpu.memory_space<vmem>>, vector<8x4xf32>
    %c0_120 = arith.constant 0 : index
    %c294 = arith.constant 294 : index
    %103 = vector.load %arg4[%c0_120, %c294] : memref<8x384xf32, #tpu.memory_space<vmem>>, vector<8x4xf32>
    tpu.vector_store %arg4[%c0_120, %c294], %102 {strides = array<i32>} : memref<8x384xf32, #tpu.memory_space<vmem>>, vector<8x4xf32>,
    %c0_121 = arith.constant 0 : index
    %c200 = arith.constant 200 : index
    %104 = vector.load %arg1[%c0_121, %c200] : memref<8x256xf32, #tpu.memory_space<vmem>>, vector<8x4xf32>
    %c0_122 = arith.constant 0 : index
    %c300 = arith.constant 300 : index
    %105 = vector.load %arg4[%c0_122, %c300] : memref<8x384xf32, #tpu.memory_space<vmem>>, vector<8x4xf32>
    tpu.vector_store %arg4[%c0_122, %c300], %104 {strides = array<i32>} : memref<8x384xf32, #tpu.memory_space<vmem>>, vector<8x4xf32>,
    %c0_123 = arith.constant 0 : index
    %c204_124 = arith.constant 204 : index
    %106 = vector.load %arg1[%c0_123, %c204_124] : memref<8x256xf32, #tpu.memory_space<vmem>>, vector<8x4xf32>
    %c0_125 = arith.constant 0 : index
    %c306 = arith.constant 306 : index
    %107 = vector.load %arg4[%c0_125, %c306] : memref<8x384xf32, #tpu.memory_space<vmem>>, vector<8x4xf32>
    tpu.vector_store %arg4[%c0_125, %c306], %106 {strides = array<i32>} : memref<8x384xf32, #tpu.memory_space<vmem>>, vector<8x4xf32>,
    %c0_126 = arith.constant 0 : index
    %c208 = arith.constant 208 : index
    %108 = vector.load %arg1[%c0_126, %c208] : memref<8x256xf32, #tpu.memory_space<vmem>>, vector<8x4xf32>
    %c0_127 = arith.constant 0 : index
    %c312 = arith.constant 312 : index
    %109 = vector.load %arg4[%c0_127, %c312] : memref<8x384xf32, #tpu.memory_space<vmem>>, vector<8x4xf32>
    tpu.vector_store %arg4[%c0_127, %c312], %108 {strides = array<i32>} : memref<8x384xf32, #tpu.memory_space<vmem>>, vector<8x4xf32>,
    %c0_128 = arith.constant 0 : index
    %c212 = arith.constant 212 : index
    %110 = vector.load %arg1[%c0_128, %c212] : memref<8x256xf32, #tpu.memory_space<vmem>>, vector<8x4xf32>
    %c0_129 = arith.constant 0 : index
    %c318 = arith.constant 318 : index
    %111 = vector.load %arg4[%c0_129, %c318] : memref<8x384xf32, #tpu.memory_space<vmem>>, vector<8x4xf32>
    tpu.vector_store %arg4[%c0_129, %c318], %110 {strides = array<i32>} : memref<8x384xf32, #tpu.memory_space<vmem>>, vector<8x4xf32>,
    %c0_130 = arith.constant 0 : index
    %c216_131 = arith.constant 216 : index
    %112 = vector.load %arg1[%c0_130, %c216_131] : memref<8x256xf32, #tpu.memory_space<vmem>>, vector<8x4xf32>
    %c0_132 = arith.constant 0 : index
    %c324 = arith.constant 324 : index
    %113 = vector.load %arg4[%c0_132, %c324] : memref<8x384xf32, #tpu.memory_space<vmem>>, vector<8x4xf32>
    tpu.vector_store %arg4[%c0_132, %c324], %112 {strides = array<i32>} : memref<8x384xf32, #tpu.memory_space<vmem>>, vector<8x4xf32>,
    %c0_133 = arith.constant 0 : index
    %c220 = arith.constant 220 : index
    %114 = vector.load %arg1[%c0_133, %c220] : memref<8x256xf32, #tpu.memory_space<vmem>>, vector<8x4xf32>
    %c0_134 = arith.constant 0 : index
    %c330 = arith.constant 330 : index
    %115 = vector.load %arg4[%c0_134, %c330] : memref<8x384xf32, #tpu.memory_space<vmem>>, vector<8x4xf32>
    tpu.vector_store %arg4[%c0_134, %c330], %114 {strides = array<i32>} : memref<8x384xf32, #tpu.memory_space<vmem>>, vector<8x4xf32>,
    %c0_135 = arith.constant 0 : index
    %c224 = arith.constant 224 : index
    %116 = vector.load %arg1[%c0_135, %c224] : memref<8x256xf32, #tpu.memory_space<vmem>>, vector<8x4xf32>
    %c0_136 = arith.constant 0 : index
    %c336 = arith.constant 336 : index
    %117 = vector.load %arg4[%c0_136, %c336] : memref<8x384xf32, #tpu.memory_space<vmem>>, vector<8x4xf32>
    tpu.vector_store %arg4[%c0_136, %c336], %116 {strides = array<i32>} : memref<8x384xf32, #tpu.memory_space<vmem>>, vector<8x4xf32>,
    %c0_137 = arith.constant 0 : index
    %c228_138 = arith.constant 228 : index
    %118 = vector.load %arg1[%c0_137, %c228_138] : memref<8x256xf32, #tpu.memory_space<vmem>>, vector<8x4xf32>
    %c0_139 = arith.constant 0 : index
    %c342 = arith.constant 342 : index
    %119 = vector.load %arg4[%c0_139, %c342] : memref<8x384xf32, #tpu.memory_space<vmem>>, vector<8x4xf32>
    tpu.vector_store %arg4[%c0_139, %c342], %118 {strides = array<i32>} : memref<8x384xf32, #tpu.memory_space<vmem>>, vector<8x4xf32>,
    %c0_140 = arith.constant 0 : index
    %c232 = arith.constant 232 : index
    %120 = vector.load %arg1[%c0_140, %c232] : memref<8x256xf32, #tpu.memory_space<vmem>>, vector<8x4xf32>
    %c0_141 = arith.constant 0 : index
    %c348 = arith.constant 348 : index
    %121 = vector.load %arg4[%c0_141, %c348] : memref<8x384xf32, #tpu.memory_space<vmem>>, vector<8x4xf32>
    tpu.vector_store %arg4[%c0_141, %c348], %120 {strides = array<i32>} : memref<8x384xf32, #tpu.memory_space<vmem>>, vector<8x4xf32>,
    %c0_142 = arith.constant 0 : index
    %c236 = arith.constant 236 : index
    %122 = vector.load %arg1[%c0_142, %c236] : memref<8x256xf32, #tpu.memory_space<vmem>>, vector<8x4xf32>
    %c0_143 = arith.constant 0 : index
    %c354 = arith.constant 354 : index
    %123 = vector.load %arg4[%c0_143, %c354] : memref<8x384xf32, #tpu.memory_space<vmem>>, vector<8x4xf32>
    tpu.vector_store %arg4[%c0_143, %c354], %122 {strides = array<i32>} : memref<8x384xf32, #tpu.memory_space<vmem>>, vector<8x4xf32>,
    %c0_144 = arith.constant 0 : index
    %c240_145 = arith.constant 240 : index
    %124 = vector.load %arg1[%c0_144, %c240_145] : memref<8x256xf32, #tpu.memory_space<vmem>>, vector<8x4xf32>
    %c0_146 = arith.constant 0 : index
    %c360 = arith.constant 360 : index
    %125 = vector.load %arg4[%c0_146, %c360] : memref<8x384xf32, #tpu.memory_space<vmem>>, vector<8x4xf32>
    tpu.vector_store %arg4[%c0_146, %c360], %124 {strides = array<i32>} : memref<8x384xf32, #tpu.memory_space<vmem>>, vector<8x4xf32>,
    %c0_147 = arith.constant 0 : index
    %c244 = arith.constant 244 : index
    %126 = vector.load %arg1[%c0_147, %c244] : memref<8x256xf32, #tpu.memory_space<vmem>>, vector<8x4xf32>
    %c0_148 = arith.constant 0 : index
    %c366 = arith.constant 366 : index
    %127 = vector.load %arg4[%c0_148, %c366] : memref<8x384xf32, #tpu.memory_space<vmem>>, vector<8x4xf32>
    tpu.vector_store %arg4[%c0_148, %c366], %126 {strides = array<i32>} : memref<8x384xf32, #tpu.memory_space<vmem>>, vector<8x4xf32>,
    %c0_149 = arith.constant 0 : index
    %c248 = arith.constant 248 : index
    %128 = vector.load %arg1[%c0_149, %c248] : memref<8x256xf32, #tpu.memory_space<vmem>>, vector<8x4xf32>
    %c0_150 = arith.constant 0 : index
    %c372 = arith.constant 372 : index
    %129 = vector.load %arg4[%c0_150, %c372] : memref<8x384xf32, #tpu.memory_space<vmem>>, vector<8x4xf32>
    tpu.vector_store %arg4[%c0_150, %c372], %128 {strides = array<i32>} : memref<8x384xf32, #tpu.memory_space<vmem>>, vector<8x4xf32>,
    %c0_151 = arith.constant 0 : index
    %c252_152 = arith.constant 252 : index
    %130 = vector.load %arg1[%c0_151, %c252_152] : memref<8x256xf32, #tpu.memory_space<vmem>>, vector<8x4xf32>
    %c0_153 = arith.constant 0 : index
    %c378 = arith.constant 378 : index
    %131 = vector.load %arg4[%c0_153, %c378] : memref<8x384xf32, #tpu.memory_space<vmem>>, vector<8x4xf32>
    tpu.vector_store %arg4[%c0_153, %c378], %130 {strides = array<i32>} : memref<8x384xf32, #tpu.memory_space<vmem>>, vector<8x4xf32>,
    %c0_154 = arith.constant 0 : index
    %c0_155 = arith.constant 0 : index
    %132 = vector.load %arg3[%c0_154, %c0_155] : memref<2x256xi32, #tpu.memory_space<vmem>>, vector<2x256xi32>
    %c512_i32 = arith.constant 512 : i32
    %133 = arith.muli %arg0, %c512_i32 : i32
    %134 = vector.broadcast %133 : i32 to vector<2x256xi32>
    %135 = arith.addi %132, %134 : vector<2x256xi32>
    %c0_156 = arith.constant 0 : index
    %c0_157 = arith.constant 0 : index
    %136 = vector.load %arg5[%c0_156, %c0_157] : memref<2x256xi32, #tpu.memory_space<vmem>>, vector<2x256xi32>
    tpu.vector_store %arg5[%c0_156, %c0_157], %135 {strides = array<i32>} : memref<2x256xi32, #tpu.memory_space<vmem>>, vector<2x256xi32>,
    return
  }
  func.func @transform_0(%arg0: i32) -> (i32, i32) {
    %c0_i32 = arith.constant 0 : i32
    %c0_i32_0 = arith.constant 0 : i32
    return %arg0, %c0_i32 : i32, i32
  }
  func.func @transform_1(%arg0: i32) -> (i32, i32) {
    %c0_i32 = arith.constant 0 : i32
    %c0_i32_0 = arith.constant 0 : i32
    %c0_i32_1 = arith.constant 0 : i32
    return %c0_i32, %c0_i32_0 : i32, i32
  }
  func.func @transform_2(%arg0: i32) -> (i32, i32) {
    %c0_i32 = arith.constant 0 : i32
    %c0_i32_0 = arith.constant 0 : i32
    %c0_i32_1 = arith.constant 0 : i32
    return %c0_i32, %c0_i32_0 : i32, i32
  }
  func.func @transform_3(%arg0: i32) -> (i32, i32) {
    %c0_i32 = arith.constant 0 : i32
    %c0_i32_0 = arith.constant 0 : i32
    return %arg0, %c0_i32 : i32, i32
  }
  func.func @transform_4(%arg0: i32) -> (i32, i32) {
    %c0_i32 = arith.constant 0 : i32
    %c0_i32_0 = arith.constant 0 : i32
    return %c0_i32, %arg0 : i32, i32
  }
}

</mosaic_0001>

<bundles_post_ra>
// kernel: tpu_custom_call.1
= control target key start
LH: loop header
LB: loop body
LE: loop exit
PB: predicated region body
PF: predicated region fallthrough
CT: control target
= control target key end

     0   :  { %10 = vsyncpa [#allocation3], 0  ;;  %s1628_s0 = inlined_call_operand.hbm [shape: f32[16,256], index: 0, kind: input, shape index: {}]   ;;  %s1629_s1 = inlined_call_operand.hbm [shape: f32[1,384], index: 1, kind: input, shape index: {}]   ;;  %s1630_s2 = inlined_call_operand.hbm [shape: s32[2,256], index: 2, kind: input, shape index: {}]   ;;  %s1631_s3 = inlined_call_operand.hbm [shape: f32[16,384], index: 3, kind: output, shape index: {0}]   ;;  %s1632_s4 = inlined_call_operand.hbm [shape: s32[2,512], index: 4, kind: output, shape index: {1}]  }
   0x1   :  { %12 = vsyncpa [#allocation3 + $0x1], 0 }
   0x2   :  { %13 = vsyncpa [#allocation6], 0 }
   0x3   :  { %14 = vsyncpa [#allocation4], 0 }
   0x4   :  { %16 = vsyncpa [#allocation4 + $0x1], 0 }
   0x5   :  { %17 = vsyncpa [#allocation10], 0 }
   0x6   :  { %19 = vsyncpa [#allocation10 + $0x1], 0  ;;  %s1321_s15 = smov 0   ;;  %s1323_s16 = smov 0  }
   0x7   :  { %s1325_s17 = smov 0   ;;  %s1327_s18 = smov 0  }
   0x8 LB: > { %s1342_s19 = sadd.s32 4294967295, %s1229_s18   ;;  %s878_s20 = sadd.s32 4294967294, %s1229_s18   ;;  %s1229_s18 = sphi %s1327_s18, %s1642_s18   ;;  %s1225_s17 = sphi %s1325_s17, %s1641_s17   ;;  %s1221_s16 = sphi %s1323_s16, %s1640_s16   ;;  %s1217_s15 = sphi %s1321_s15, %s1639_s15  }
   0x9   : > { %p45_p0 = scmp.ne.s32.totalorder %s1221_s16, %s1217_s15  ;;  %p46_p1 = scmp.eq.s32.totalorder %s1342_s19, 0 }
   0xa   : > { %p111_p2 = scmp.eq.s32.totalorder %s1342_s19, 1  ;;  %p117_p3 = scmp.eq.s32.totalorder %s878_s20, 1 }
   0xb   : > { %p1351_p4 = por %p46_p1, %p45_p0  ;;  %p879_p5 = scmp.ge.s32.totalorder %s1229_s18, 1 }
   0xc   : > { %p1356_p6 = por %p117_p3, %p45_p0  ;;  %p150_p7 = scmp.lt.s32.totalorder %s1229_s18, 3 }
   0xd   : > { %s162_s25 = sshll.u32 %s1629_s1, 4  ;;  %s1231_s27 = smov [#allocation5]   ;;  %s163_s25 = int_to_ptr.hbm [resolvable:$true] %s162_s25 }
   0xe   : > { %p1364_p8 = pnand %p879_p5, %p150_p7  ;;  %s164_s28 = sshll.u32 %s1231_s27, 4  ;;  %s165_s28 = int_to_ptr.vmem [resolvable:$true] %s164_s28 }
   0xf   : > { %s174_s5 = sshll.u32 %s1630_s2, 4  ;;  %s1232_s6 = smov [#allocation7]   ;;  %s175_s5 = int_to_ptr.hbm [resolvable:$true] %s174_s5 }
  0x10   : > { %p916_p10 = pneg %p1364_p8  ;;  %s176_s7 = sshll.u32 %s1232_s6, 4  ;;  %s177_s7 = int_to_ptr.vmem [resolvable:$true] %s176_s7 }
  0x11   : > { %s1377_s8 = sadd.s32 1, %s1229_s18   ;;  %s32_s9 = sadd.s32 1, %s1225_s17 }
  0x12   : > { %p917_p11 = pnand %p916_p10, %p46_p1  ;;  %s29_s10 = ssub.s32 %s1229_s18, %s1377_s8 }
  0x13   : > { %p39_p12 = scmp.ne.s32.totalorder %s1225_s17, %s1221_s16  ;;  %p30_p13 = scmp.eq.s32.totalorder %s29_s10, 0 }
  0x14   : > { %919 = dma.hbm_to_vmem [thread:$0]  (!%p917_p11), %s163_s25, 48, %s165_s28, [#allocation6]  }
  0x15   : > { %922 = dma.hbm_to_vmem [thread:$0]  (!%p917_p11), %s175_s5, 64, %s177_s7, [#allocation6]  }
  0x16   : > { %p40_p0 = scmp.eq.s32.totalorder %s1229_s18, 0  ;;  %p1387_p3 = por %p111_p2, %p39_p12 }
  0x17   : > { %p936_p5 = scmp.lt.s32.totalorder %s1229_s18, 2  ;;  %s187_s13 = sand.u32 1, %s1225_s17  }
  0x18   : > { %s1393_s12 = scalar_select %p30_p13, %s1225_s17, %s32_s9  }
  0x19   : > { %p41_p7 = por %p40_p0, %p39_p12  ;;  %s883_s14 = sshll.u32 %s187_s13, 4 }
  0x1a   : > { %s898_s20 = sshll.u32 %s1229_s18, 4  ;;  %s191_s27 = scalar_lea.vmem [#allocation2], %s883_s14 }
  0x1b   : > { %s196_s25 = scalar_lea.hbm %s1628_s0, %s898_s20  ;;  %s200_s28 = sshll.u32 %s191_s27, 4  ;;  %s201_s28 = int_to_ptr.vmem [resolvable:$true] %s200_s28 }
  0x1c   : > { %s198_s29 = sshll.u32 %s196_s25, 4  ;;  %p1400_p2 = pnand %p936_p5, %p41_p7  ;;  %s199_s29 = int_to_ptr.hbm [resolvable:$true] %s198_s29 }
  0x1d   : > { %s188_s5 = scalar_lea.sflag [#allocation3], %s187_s13  ;;  %s1097_s6 = sshra.s32 %s199_s29, 4  ;;  %s1098_s6 = int_to_ptr.hbm [resolvable:$true] %s1097_s6 }
  0x1e   : > { %s1099_s7 = scalar_lea.hbm %s1098_s6, 16  ;;  %p1101_p11 = pneg %p1400_p2 }
  0x1f   : > { %p1100_p10 = scmp.ne.s32.totalorder %s1098_s6, %s1099_s7  ;;  %s1104_s14 = scalar_lea.hbm %s1628_s0, 32 }
  0x20   : > { %p1105_p0 = scmp.lt.s32.totalorder %s1098_s6, %s1628_s0  ;;  %p1106_p5 = scmp.lt.s32.totalorder %s1104_s14, %s1099_s7 }
  0x21   : > { %p1102_p12 = pnand %p1101_p11, %p1100_p10 }
  0x22   : > { %p1107_p7 = por %p1106_p5, %p1105_p0 }
  0x23   : > { %p1103_p13 = pneg %p1102_p12 }
  0x25   : > { %p1108_p9 = pnand %p1107_p7, %p1103_p13 }
  0x27   : > { %1111 = shalt.err (!%p1108_p9)
}
  0x28   : > { %926 = dma.hbm_to_vmem [thread:$0]  (!%p1400_p2), %s199_s29, 256, %s201_s28, %s188_s5  }
  0x29   : > { %209 = sbr.rel (%p1364_p8) target bundleno = 330 (0x14a), region = 32  ;;  %s1417_s13 = sand.u32 (!%p1364_p8), 1, %s1221_s16  }
  0x2a   : > { %s887_s24 = sshll.u32 (!%p1364_p8), %s1417_s13, 4  ;;  %s212_s25 = scalar_lea.sflag (!%p1364_p8), [#allocation3], %s1417_s13 }
  0x2b   : > { %s1421_s27 = scalar_lea.vmem (!%p1364_p8), [#allocation2], %s887_s24 }
  0x2e   : > { %1200 = dma.done.wait (%p1351_p4), %s212_s25, 256  }
  0x2f   : > { %1202 = vsyncadd (%p1351_p4), %s212_s25, 4294967040 }
  0x30   : > { %1204 = dma.done.wait (%p46_p1), [#allocation6], 112  }
  0x31   : > { %1206 = vsyncadd (%p46_p1), [#allocation6], 4294967184  ;;  %v1432_v0 = vld [vmem:[%s1421_s27] sm:$0xff]  ;;  %s1233_s26 = smov 2   ;;  %s1234_s28 = smov 6   ;;  %v1466_v1 = vld [vmem:[%s1421_s27 + $0x8] sm:$0xff] }
  0x32   : > { %273 = vrot.lane.b32.xlu0 %v1432_v0, %s1233_s26  ;;  %287 = vrot.lane.b32.xlu1 %v1432_v0, %s1234_s28  ;;  %s1235_s29 = smov 10   ;;  %s1236_s21 = smov 4   ;;  %v1468_v2 = vld [vmem:[#allocation5] sm:$0x7]  ;;  %vm269_vm0 = vcmask 31744   ;;  %vm276_vm1 = vcmask 80944  }
  0x33   : > { %301 = vrot.lane.b32.xlu2 %v1432_v0, %s1235_s29  ;;  %s1237_s30 = smov 8   ;;  %s1238_s5 = smov 12   ;;  %v259_v3 = vperm.slane %v1468_v2, 0  ;;  %vm283_vm2 = vcmask 130144   ;;  %vm290_vm3 = vcmask 179344   ;;  %vm297_vm4 = vcmask 228544  }
  0x34   : > { %s1239_s6 = smov 14   ;;  %s1240_s7 = smov 16   ;;  %vm304_vm5 = vcmask 277744   ;;  %vm311_vm6 = vcmask 326944   ;;  %vm318_vm7 = vcmask 376144   ;;  %vm325_vm8 = vcmask 425344  }
  0x35   : > { %s1241_s9 = smov 18   ;;  %s1242_s10 = smov 20   ;;  %vm332_vm9 = vcmask 474544   ;;  %v260_v15 = vperm.slane %v1468_v2, 1  ;;  %vm339_vm10 = vcmask 523744   ;;  %vm346_vm11 = vcmask 572944  }
  0x36   : > { %s1243_s14 = smov 22   ;;  %s1244_s20 = smov 24   ;;  %vm353_vm12 = vcmask 622144   ;;  %vm418_vm13 = vcmask 15360   ;;  %vm360_vm14 = vcmask 671344   ;;  %vm367_vm15 = vcmask 720544  }
  0x37   : > { %s1245_s23 = smov 26   ;;  %s1246_s24 = smov 28   ;;  %v261_v37 = vperm.slane %v1468_v2, 2  ;;  %v714_v57 = vld [vmem:[#allocation7] sm:$0xf] }
  0x38   : > { %s1247_s25 = smov 30   ;;  %s1248_s26 = smov 32  }
  0x39   : > { %s1249_s28 = smov 34   ;;  %s1250_s29 = smov 36  }
  0x3a   : > { %280 = vrot.lane.b32.xlu0 %v1432_v0, %s1236_s21  ;;  %294 = vrot.lane.b32.xlu1 %v1432_v0, %s1237_s30  ;;  %s1251_s21 = smov 38   ;;  %s1252_s30 = smov 40  }
  0x3b   : > { %308 = vrot.lane.b32.xlu2 %v1432_v0, %s1238_s5  ;;  %s1253_s5 = smov 42   ;;  %s1266_s27 = smov 68  }
  0x42   : > { %315 = vrot.lane.b32.xlu0 %v1432_v0, %s1239_s6  ;;  %322 = vrot.lane.b32.xlu1 %v1432_v0, %s1240_s7  ;;  %s1254_s6 = smov 44   ;;  %s1255_s7 = smov 46  }
  0x43   : > { %329 = vrot.lane.b32.xlu2 %v1432_v0, %s1241_s9  ;;  %s1256_s9 = smov 48  }
  0x4a   : > { %336 = vrot.lane.b32.xlu0 %v1432_v0, %s1242_s10  ;;  %343 = vrot.lane.b32.xlu1 %v1432_v0, %s1243_s14  ;;  %s1257_s10 = smov 50   ;;  %s1258_s14 = smov 52  }
  0x4b   : > { %350 = vrot.lane.b32.xlu2 %v1432_v0, %s1244_s20  ;;  %s1259_s20 = smov 54  }
  0x52   : > { %357 = vrot.lane.b32.xlu0 %v1432_v0, %s1245_s23  ;;  %364 = vrot.lane.b32.xlu1 %v1432_v0, %s1246_s24  ;;  %s1260_s23 = smov 56   ;;  %s1261_s24 = smov 58  }
  0x53   : > { %371 = vrot.lane.b32.xlu2 %v1432_v0, %s1247_s25  ;;  %s1262_s25 = smov 60  }
  0x5a   : > { %378 = vrot.lane.b32.xlu0 %v1432_v0, %s1248_s26  ;;  %385 = vrot.lane.b32.xlu1 %v1432_v0, %s1249_s28  ;;  %s900_s26 = smul.u32 24, %s1417_s13  ;;  %s1263_s28 = smov 62  }
  0x5b   : > { %392 = vrot.lane.b32.xlu2 %v1432_v0, %s1250_s29  ;;  %s1264_s29 = smov 64  }
  0x62   : > { %399 = vrot.lane.b32.xlu0 %v1432_v0, %s1251_s21  ;;  %406 = vrot.lane.b32.xlu1 %v1432_v0, %s1252_s30  ;;  %s1265_s21 = smov 66   ;;  %s1474_s30 = scalar_lea.vmem [#allocation8], %s900_s26 }
  0x63   : > { %413 = vrot.lane.b32.xlu2 %v1432_v0, %s1253_s5  ;;  %265 = vst [vmem:[%s1474_s30] sm:$0xff] %v259_v3  ;;  %s1267_s5 = smov 70   ;;  %s1277_s26 = smov 90  }
  0x64   : > { %270 = vst.msk [vmem:[%s1474_s30] sm:$0xff] %vm269_vm0, %v1432_v0  ;;  %vm374_vm0 = vcmask 769744  }
  0x65   : > { %266 = vst [vmem:[%s1474_s30 + $0x8] sm:$0xff] %v260_v15 }
  0x66   : > { %267 = vst [vmem:[%s1474_s30 + $0x10] sm:$0xff] %v261_v37 }
  0x6a   : > { %422 = vrot.lane.b32.xlu0 %v1432_v0, %s1254_s6  ;;  %429 = vrot.lane.b32.xlu1 %v1432_v0, %s1255_s7  ;;  %s1268_s6 = smov 72   ;;  %s1269_s7 = smov 74  }
  0x6b   : > { %436 = vrot.lane.b32.xlu2 %v1432_v0, %s1256_s9  ;;  %s1270_s9 = smov 76  }
  0x72   : > { %443 = vrot.lane.b32.xlu0 %v1432_v0, %s1257_s10  ;;  %450 = vrot.lane.b32.xlu1 %v1432_v0, %s1258_s14  ;;  %s1271_s10 = smov 78   ;;  %s1272_s14 = smov 80  }
  0x73   : > { %457 = vrot.lane.b32.xlu2 %v1432_v0, %s1259_s20  ;;  %s1273_s20 = smov 82  }
  0x7a   : > { %464 = vrot.lane.b32.xlu0 %v1432_v0, %s1260_s23  ;;  %471 = vrot.lane.b32.xlu1 %v1432_v0, %s1261_s24  ;;  %s1274_s23 = smov 84   ;;  %s1275_s24 = smov 86  }
  0x7b   : > { %478 = vrot.lane.b32.xlu2 %v1432_v0, %s1262_s25  ;;  %s1276_s25 = smov 88  }
  0x82   : > { %485 = vrot.lane.b32.xlu0 %v1432_v0, %s1263_s28  ;;  %492 = vrot.lane.b32.xlu1 %v1466_v1, %s1264_s29  ;;  %s1278_s28 = smov 92   ;;  %s1279_s29 = smov 94  }
  0x83   : > { %499 = vrot.lane.b32.xlu2 %v1466_v1, %s1265_s21  ;;  %s1280_s21 = smov 96  }
  0x8a   : > { %506 = vrot.lane.b32.xlu0 %v1466_v1, %s1266_s27  ;;  %513 = vrot.lane.b32.xlu1 %v1466_v1, %s1267_s5  ;;  %s1281_s27 = smov 98   ;;  %s1282_s5 = smov 100  }
  0x8b   : > { %520 = vrot.lane.b32.xlu2 %v1466_v1, %s1268_s6  ;;  %s1283_s6 = smov 102  }
  0x8d   : > { %v302_v4 = vpop.permute.xlu2 %301 }
  0x92   : > { %527 = vrot.lane.b32.xlu0 %v1466_v1, %s1269_s7  ;;  %534 = vrot.lane.b32.xlu1 %v1466_v1, %s1270_s9  ;;  %s1284_s7 = smov 104   ;;  %s1285_s9 = smov 106  }
  0x93   : > { %541 = vrot.lane.b32.xlu2 %v1466_v1, %s1271_s10  ;;  %s1286_s10 = smov 108  }
  0x95   : > { %v309_v5 = vpop.permute.xlu2 %308 }
  0x9a   : > { %548 = vrot.lane.b32.xlu0 %v1466_v1, %s1272_s14  ;;  %555 = vrot.lane.b32.xlu1 %v1466_v1, %s1273_s20  ;;  %s1287_s14 = smov 110   ;;  %s1288_s20 = smov 112  }
  0x9b   : > { %562 = vrot.lane.b32.xlu2 %v1466_v1, %s1274_s23  ;;  %s1289_s23 = smov 114  }
  0x9d   : > { %v330_v6 = vpop.permute.xlu2 %329 }
  0xa2   : > { %569 = vrot.lane.b32.xlu0 %v1466_v1, %s1275_s24  ;;  %576 = vrot.lane.b32.xlu1 %v1466_v1, %s1276_s25  ;;  %s1290_s24 = smov 116   ;;  %s1291_s25 = smov 118  }
  0xa3   : > { %583 = vrot.lane.b32.xlu2 %v1466_v1, %s1277_s26  ;;  %s1292_s26 = smov 120  }
  0xa4   : > { %v274_v7 = vpop.permute.xlu0 %273  ;;  %v288_v8 = vpop.permute.xlu1 %287 }
  0xa5   : > { %277 = vst.msk [vmem:[%s1474_s30] sm:$0xff] %vm276_vm1, %v274_v7  ;;  %v351_v9 = vpop.permute.xlu2 %350  ;;  %vm381_vm1 = vcmask 818944  }
  0xaa   : > { %590 = vrot.lane.b32.xlu0 %v1466_v1, %s1278_s28  ;;  %597 = vrot.lane.b32.xlu1 %v1466_v1, %s1279_s29  ;;  %s1293_s28 = smov 122   ;;  %s1294_s29 = smov 124  }
  0xab   : > { %604 = vrot.lane.b32.xlu2 %v1466_v1, %s1280_s21  ;;  %s1295_s21 = smov 126  }
  0xac   : > { %v281_v10 = vpop.permute.xlu0 %280  ;;  %v295_v11 = vpop.permute.xlu1 %294 }
  0xad   : > { %284 = vst.msk [vmem:[%s1474_s30] sm:$0xff] %vm283_vm2, %v281_v10  ;;  %v372_v12 = vpop.permute.xlu2 %371  ;;  %vm388_vm2 = vcmask 868144  }
  0xae   : > { %291 = vst.msk [vmem:[%s1474_s30] sm:$0xff] %vm290_vm3, %v288_v8  ;;  %vm395_vm3 = vcmask 917344  }
  0xaf   : > { %298 = vst.msk [vmem:[%s1474_s30] sm:$0xff] %vm297_vm4, %v295_v11  ;;  %vm402_vm4 = vcmask 966544  }
  0xb0   : > { %305 = vst.msk [vmem:[%s1474_s30] sm:$0xff] %vm304_vm5, %v302_v4  ;;  %vm409_vm5 = vcmask 1015744  }
  0xb1   : > { %312 = vst.msk [vmem:[%s1474_s30] sm:$0xff] %vm311_vm6, %v309_v5  ;;  %vm416_vm6 = vcmask 1048560  }
  0xb2   : > { %611 = vrot.lane.b32.xlu0 %v1466_v1, %s1281_s27  ;;  %618 = vrot.lane.b32.xlu1 %v1466_v1, %s1282_s5  ;;  %s890_s27 = sshll.u32 %s1417_s13, 2  ;;  %s899_s5 = sshll.u32 %s1342_s19, 2 }
  0xb3   : > { %625 = vrot.lane.b32.xlu2 %v1466_v1, %s1283_s6 }
  0xb4   : > { %v316_v13 = vpop.permute.xlu0 %315  ;;  %v323_v14 = vpop.permute.xlu1 %322 }
  0xb5   : > { %319 = vst.msk [vmem:[%s1474_s30] sm:$0xff] %vm318_vm7, %v316_v13  ;;  %v393_v16 = vpop.permute.xlu2 %392  ;;  %vm425_vm7 = vcmask 64544  }
  0xb6   : > { %326 = vst.msk [vmem:[%s1474_s30] sm:$0xff] %vm325_vm8, %v323_v14  ;;  %vm432_vm8 = vcmask 113744  }
  0xb7   : > { %333 = vst.msk [vmem:[%s1474_s30] sm:$0xff] %vm332_vm9, %v330_v6  ;;  %vm439_vm9 = vcmask 162944  }
  0xba   : > { %632 = vrot.lane.b32.xlu0 %v1466_v1, %s1284_s7  ;;  %639 = vrot.lane.b32.xlu1 %v1466_v1, %s1285_s9  ;;  %s751_s9 = scalar_lea.hbm %s1632_s4, %s899_s5 }
  0xbb   : > { %646 = vrot.lane.b32.xlu2 %v1466_v1, %s1286_s10  ;;  %s891_s10 = sshll.u32 %s1342_s19, 9 }
  0xbc   : > { %v337_v17 = vpop.permute.xlu0 %336  ;;  %v344_v18 = vpop.permute.xlu1 %343  ;;  %v716_v58 = vstv %s891_s10 }
  0xbd   : > { %340 = vst.msk [vmem:[%s1474_s30] sm:$0xff] %vm339_vm10, %v337_v17  ;;  %v414_v19 = vpop.permute.xlu2 %413  ;;  %vm446_vm10 = vcmask 212144   ;;  %v717_v60 = vadd.s32 %v716_v58, %v714_v57 }
  0xbe   : > { %347 = vst.msk [vmem:[%s1474_s30] sm:$0xff] %vm346_vm11, %v344_v18  ;;  %vm453_vm11 = vcmask 261344  }
  0xbf   : > { %354 = vst.msk [vmem:[%s1474_s30] sm:$0xff] %vm353_vm12, %v351_v9  ;;  %vm460_vm12 = vcmask 310544  }
  0xc0   : > { %419 = vst.msk [vmem:[%s1474_s30 + $0x8] sm:$0xff] %vm418_vm13, %v414_v19  ;;  %vm467_vm13 = vcmask 359744  }
  0xc2   : > { %653 = vrot.lane.b32.xlu0 %v1466_v1, %s1287_s14  ;;  %660 = vrot.lane.b32.xlu1 %v1466_v1, %s1288_s20  ;;  %s255_s14 = scalar_lea.vmem [#allocation9], %s890_s27 }
  0xc3   : > { %667 = vrot.lane.b32.xlu2 %v1466_v1, %s1289_s23  ;;  %s753_s20 = sshll.u32 %s255_s14, 4  ;;  %s755_s23 = sshll.u32 %s751_s9, 4  ;;  %718 = vst [vmem:[%s255_s14] sm:$0xf] %v717_v60  ;;  %s754_s20 = int_to_ptr.vmem [resolvable:$true] %s753_s20  ;;  %s756_s23 = int_to_ptr.hbm [resolvable:$true] %s755_s23 }
  0xc4   : > { %v358_v20 = vpop.permute.xlu0 %357  ;;  %v365_v21 = vpop.permute.xlu1 %364 }
  0xc5   : > { %361 = vst.msk [vmem:[%s1474_s30] sm:$0xff] %vm360_vm14, %v358_v20  ;;  %v437_v22 = vpop.permute.xlu2 %436  ;;  %vm474_vm14 = vcmask 408944  }
  0xc6   : > { %368 = vst.msk [vmem:[%s1474_s30] sm:$0xff] %vm367_vm15, %v365_v21  ;;  %vm481_vm15 = vcmask 458144  }
  0xc7   : > { %375 = vst.msk [vmem:[%s1474_s30] sm:$0xff] %vm374_vm0, %v372_v12  ;;  %vm488_vm0 = vcmask 507344  }
  0xca   : > { %674 = vrot.lane.b32.xlu0 %v1466_v1, %s1290_s24  ;;  %681 = vrot.lane.b32.xlu1 %v1466_v1, %s1291_s25  ;;  %s725_s24 = scalar_lea.sflag [#allocation10], %s1417_s13  ;;  %s1141_s25 = sshra.s32 %s756_s23, 4  ;;  %s1142_s25 = int_to_ptr.hbm [resolvable:$true] %s1141_s25 }
  0xcb   : > { %688 = vrot.lane.b32.xlu2 %v1466_v1, %s1292_s26  ;;  %s1143_s26 = scalar_lea.hbm %s1142_s25, 4  ;;  %p1148_p9 = scmp.lt.s32.totalorder %s1142_s25, %s1632_s4 }
  0xcc   : > { %v379_v23 = vpop.permute.xlu0 %378  ;;  %v386_v24 = vpop.permute.xlu1 %385  ;;  %p1144_p1 = scmp.ne.s32.totalorder %s1142_s25, %s1143_s26 }
  0xcd   : > { %382 = vst.msk [vmem:[%s1474_s30] sm:$0xff] %vm381_vm1, %v379_v23  ;;  %v458_v25 = vpop.permute.xlu2 %457  ;;  %vm495_vm1 = vcmask 556544  }
  0xce   : > { %389 = vst.msk [vmem:[%s1474_s30] sm:$0xff] %vm388_vm2, %v386_v24  ;;  %vm502_vm2 = vcmask 605744   ;;  %p1145_p4 = pnand %p1144_p1, %p1387_p3 }
  0xcf   : > { %396 = vst.msk [vmem:[%s1474_s30] sm:$0xff] %vm395_vm3, %v393_v16  ;;  %vm509_vm3 = vcmask 654944  }
  0xd0   : > { %p1146_p8 = pneg %p1145_p4 }
  0xd2   : > { %695 = vrot.lane.b32.xlu0 %v1466_v1, %s1293_s28  ;;  %702 = vrot.lane.b32.xlu1 %v1466_v1, %s1294_s29 }
  0xd3   : > { %709 = vrot.lane.b32.xlu2 %v1466_v1, %s1295_s21  ;;  %s1147_s21 = scalar_lea.hbm %s1632_s4, 8 }
  0xd4   : > { %v400_v26 = vpop.permute.xlu0 %399  ;;  %v407_v27 = vpop.permute.xlu1 %406  ;;  %p1149_p2 = scmp.lt.s32.totalorder %s1147_s21, %s1143_s26 }
  0xd5   : > { %403 = vst.msk [vmem:[%s1474_s30] sm:$0xff] %vm402_vm4, %v400_v26  ;;  %v479_v28 = vpop.permute.xlu2 %478  ;;  %vm516_vm4 = vcmask 704144  }
  0xd6   : > { %410 = vst.msk [vmem:[%s1474_s30] sm:$0xff] %vm409_vm5, %v407_v27  ;;  %vm523_vm5 = vcmask 753344   ;;  %p1150_p10 = por %p1149_p2, %p1148_p9 }
  0xd7   : > { %417 = vst.msk [vmem:[%s1474_s30] sm:$0xff] %vm416_vm6, %v414_v19  ;;  %vm530_vm6 = vcmask 802544  }
  0xd8   : > { %p1151_p11 = pnand %p1150_p10, %p1146_p8 }
  0xdc   : > { %v423_v29 = vpop.permute.xlu0 %422  ;;  %v430_v30 = vpop.permute.xlu1 %429 }
  0xdd   : > { %426 = vst.msk [vmem:[%s1474_s30 + $0x8] sm:$0xff] %vm425_vm7, %v423_v29  ;;  %v500_v31 = vpop.permute.xlu2 %499  ;;  %vm537_vm7 = vcmask 851744  }
  0xde   : > { %433 = vst.msk [vmem:[%s1474_s30 + $0x8] sm:$0xff] %vm432_vm8, %v430_v30  ;;  %vm544_vm8 = vcmask 900944  }
  0xdf   : > { %440 = vst.msk [vmem:[%s1474_s30 + $0x8] sm:$0xff] %vm439_vm9, %v437_v22  ;;  %vm551_vm9 = vcmask 950144  }
  0xe4   : > { %v444_v32 = vpop.permute.xlu0 %443  ;;  %v451_v33 = vpop.permute.xlu1 %450 }
  0xe5   : > { %447 = vst.msk [vmem:[%s1474_s30 + $0x8] sm:$0xff] %vm446_vm10, %v444_v32  ;;  %v521_v34 = vpop.permute.xlu2 %520  ;;  %vm558_vm10 = vcmask 999344  }
  0xe6   : > { %454 = vst.msk [vmem:[%s1474_s30 + $0x8] sm:$0xff] %vm453_vm11, %v451_v33  ;;  %vm565_vm11 = vcmask 1048544  }
  0xe7   : > { %461 = vst.msk [vmem:[%s1474_s30 + $0x8] sm:$0xff] %vm460_vm12, %v458_v25  ;;  %vm572_vm12 = vcmask 48144  }
  0xec   : > { %v465_v35 = vpop.permute.xlu0 %464  ;;  %v472_v36 = vpop.permute.xlu1 %471 }
  0xed   : > { %468 = vst.msk [vmem:[%s1474_s30 + $0x8] sm:$0xff] %vm467_vm13, %v465_v35  ;;  %v542_v38 = vpop.permute.xlu2 %541  ;;  %vm579_vm13 = vcmask 97344  }
  0xee   : > { %475 = vst.msk [vmem:[%s1474_s30 + $0x8] sm:$0xff] %vm474_vm14, %v472_v36  ;;  %vm586_vm14 = vcmask 146544  }
  0xef   : > { %482 = vst.msk [vmem:[%s1474_s30 + $0x8] sm:$0xff] %vm481_vm15, %v479_v28  ;;  %vm593_vm15 = vcmask 195744  }
  0xf4   : > { %v486_v39 = vpop.permute.xlu0 %485  ;;  %v493_v40 = vpop.permute.xlu1 %492 }
  0xf5   : > { %489 = vst.msk [vmem:[%s1474_s30 + $0x8] sm:$0xff] %vm488_vm0, %v486_v39  ;;  %v563_v43 = vpop.permute.xlu2 %562  ;;  %vm600_vm0 = vcmask 244944  }
  0xf6   : > { %496 = vst.msk [vmem:[%s1474_s30 + $0x8] sm:$0xff] %vm495_vm1, %v493_v40  ;;  %vm607_vm1 = vcmask 294144  }
  0xf7   : > { %503 = vst.msk [vmem:[%s1474_s30 + $0x8] sm:$0xff] %vm502_vm2, %v500_v31  ;;  %vm614_vm2 = vcmask 343344  }
  0xfc   : > { %v507_v41 = vpop.permute.xlu0 %506  ;;  %v514_v42 = vpop.permute.xlu1 %513 }
  0xfd   : > { %510 = vst.msk [vmem:[%s1474_s30 + $0x8] sm:$0xff] %vm509_vm3, %v507_v41  ;;  %v584_v46 = vpop.permute.xlu2 %583  ;;  %vm621_vm3 = vcmask 392544  }
  0xfe   : > { %517 = vst.msk [vmem:[%s1474_s30 + $0x8] sm:$0xff] %vm516_vm4, %v514_v42  ;;  %vm628_vm4 = vcmask 441744  }
  0xff   : > { %524 = vst.msk [vmem:[%s1474_s30 + $0x8] sm:$0xff] %vm523_vm5, %v521_v34 }
 0x104   : > { %v528_v44 = vpop.permute.xlu0 %527  ;;  %v535_v45 = vpop.permute.xlu1 %534 }
 0x105   : > { %531 = vst.msk [vmem:[%s1474_s30 + $0x8] sm:$0xff] %vm530_vm6, %v528_v44  ;;  %v605_v49 = vpop.permute.xlu2 %604 }
 0x106   : > { %538 = vst.msk [vmem:[%s1474_s30 + $0x8] sm:$0xff] %vm537_vm7, %v535_v45 }
 0x107   : > { %545 = vst.msk [vmem:[%s1474_s30 + $0x8] sm:$0xff] %vm544_vm8, %v542_v38 }
 0x10c   : > { %v549_v47 = vpop.permute.xlu0 %548  ;;  %v556_v48 = vpop.permute.xlu1 %555 }
 0x10d   : > { %552 = vst.msk [vmem:[%s1474_s30 + $0x8] sm:$0xff] %vm551_vm9, %v549_v47  ;;  %v626_v52 = vpop.permute.xlu2 %625 }
 0x10e   : > { %559 = vst.msk [vmem:[%s1474_s30 + $0x8] sm:$0xff] %vm558_vm10, %v556_v48 }
 0x10f   : > { %566 = vst.msk [vmem:[%s1474_s30 + $0x8] sm:$0xff] %vm565_vm11, %v563_v43 }
 0x114   : > { %v570_v50 = vpop.permute.xlu0 %569  ;;  %v577_v51 = vpop.permute.xlu1 %576 }
 0x115   : > { %573 = vst.msk [vmem:[%s1474_s30 + $0x10] sm:$0xff] %vm572_vm12, %v570_v50  ;;  %v647_v59 = vpop.permute.xlu2 %646 }
 0x116   : > { %580 = vst.msk [vmem:[%s1474_s30 + $0x10] sm:$0xff] %vm579_vm13, %v577_v51 }
 0x117   : > { %587 = vst.msk [vmem:[%s1474_s30 + $0x10] sm:$0xff] %vm586_vm14, %v584_v46 }
 0x11c   : > { %v591_v53 = vpop.permute.xlu0 %590  ;;  %v598_v54 = vpop.permute.xlu1 %597 }
 0x11d   : > { %594 = vst.msk [vmem:[%s1474_s30 + $0x10] sm:$0xff] %vm593_vm15, %v591_v53 }
 0x11e   : > { %601 = vst.msk [vmem:[%s1474_s30 + $0x10] sm:$0xff] %vm600_vm0, %v598_v54 }
 0x11f   : > { %608 = vst.msk [vmem:[%s1474_s30 + $0x10] sm:$0xff] %vm607_vm1, %v605_v49 }
 0x124   : > { %v612_v55 = vpop.permute.xlu0 %611  ;;  %v619_v56 = vpop.permute.xlu1 %618 }
 0x125   : > { %615 = vst.msk [vmem:[%s1474_s30 + $0x10] sm:$0xff] %vm614_vm2, %v612_v55 }
 0x126   : > { %622 = vst.msk [vmem:[%s1474_s30 + $0x10] sm:$0xff] %vm621_vm3, %v619_v56 }
 0x127   : > { %629 = vst.msk [vmem:[%s1474_s30 + $0x10] sm:$0xff] %vm628_vm4, %v626_v52 }
 0x128   : > { %1154 = shalt.err (!%p1151_p11)
}
 0x129   : > { %913 = dma.vmem_to_hbm [thread:$0]  (%p1387_p3), %s754_s20, 64, %s756_s23, %s725_s24   ;;  %vm635_vm5 = vcmask 490944   ;;  %vm642_vm6 = vcmask 540144   ;;  %vm649_vm7 = vcmask 589344   ;;  %v668_v63 = vpop.permute.xlu2 %667  ;;  %vm656_vm8 = vcmask 638544  }
 0x12a   : > { %vm663_vm9 = vcmask 687744   ;;  %vm670_vm10 = vcmask 736944   ;;  %vm677_vm11 = vcmask 786144   ;;  %vm684_vm12 = vcmask 835344   ;;  %s901_s6 = smul.u32 24, %s1342_s19  ;;  %s738_s14 = sshll.u32 %s1474_s30, 4  ;;  %s739_s14 = int_to_ptr.vmem [resolvable:$true] %s738_s14 }
 0x12b   : > { %vm691_vm13 = vcmask 884544   ;;  %vm698_vm14 = vcmask 933744   ;;  %vm705_vm15 = vcmask 982944   ;;  %vm712_vm0 = vcmask 1032144   ;;  %s720_s19 = scalar_lea.sflag [#allocation4], %s1417_s13  ;;  %s1175_s28 = scalar_lea.hbm %s1631_s3, 48 }
 0x12c   : > { %v633_v61 = vpop.permute.xlu0 %632  ;;  %v640_v62 = vpop.permute.xlu1 %639  ;;  %s736_s10 = scalar_lea.hbm %s1631_s3, %s901_s6 }
 0x12d   : > { %636 = vst.msk [vmem:[%s1474_s30 + $0x10] sm:$0xff] %vm635_vm5, %v633_v61  ;;  %s740_s20 = sshll.u32 %s736_s10, 4  ;;  %s741_s20 = int_to_ptr.hbm [resolvable:$true] %s740_s20 }
 0x12e   : > { %643 = vst.msk [vmem:[%s1474_s30 + $0x10] sm:$0xff] %vm642_vm6, %v640_v62  ;;  %s1169_s23 = sshra.s32 %s741_s20, 4  ;;  %s1170_s23 = int_to_ptr.hbm [resolvable:$true] %s1169_s23 }
 0x12f   : > { %650 = vst.msk [vmem:[%s1474_s30 + $0x10] sm:$0xff] %vm649_vm7, %v647_v59  ;;  %s1171_s24 = scalar_lea.hbm %s1170_s23, 24  ;;  %p1176_p5 = scmp.lt.s32.totalorder %s1170_s23, %s1631_s3 }
 0x130   : > { %p1172_p12 = scmp.ne.s32.totalorder %s1170_s23, %s1171_s24  ;;  %p1177_p7 = scmp.lt.s32.totalorder %s1175_s28, %s1171_s24 }
 0x131   : > { %v689_v2 = vpop.permute.xlu2 %688 }
 0x132   : > { %p1173_p13 = pnand %p1172_p12, %p1387_p3  ;;  %p1178_p1 = por %p1177_p7, %p1176_p5 }
 0x134   : > { %v654_v0 = vpop.permute.xlu0 %653  ;;  %v661_v1 = vpop.permute.xlu1 %660  ;;  %p1174_p0 = pneg %p1173_p13 }
 0x135   : > { %657 = vst.msk [vmem:[%s1474_s30 + $0x10] sm:$0xff] %vm656_vm8, %v654_v0 }
 0x136   : > { %664 = vst.msk [vmem:[%s1474_s30 + $0x10] sm:$0xff] %vm663_vm9, %v661_v1  ;;  %p1179_p4 = pnand %p1178_p1, %p1174_p0 }
 0x137   : > { %671 = vst.msk [vmem:[%s1474_s30 + $0x10] sm:$0xff] %vm670_vm10, %v668_v63 }
 0x139   : > { %v710_v5 = vpop.permute.xlu2 %709 }
 0x13c   : > { %v675_v3 = vpop.permute.xlu0 %674  ;;  %v682_v4 = vpop.permute.xlu1 %681 }
 0x13d   : > { %678 = vst.msk [vmem:[%s1474_s30 + $0x10] sm:$0xff] %vm677_vm11, %v675_v3 }
 0x13e   : > { %685 = vst.msk [vmem:[%s1474_s30 + $0x10] sm:$0xff] %vm684_vm12, %v682_v4 }
 0x13f   : > { %692 = vst.msk [vmem:[%s1474_s30 + $0x10] sm:$0xff] %vm691_vm13, %v689_v2 }
 0x144   : > { %v696_v6 = vpop.permute.xlu0 %695  ;;  %v703_v7 = vpop.permute.xlu1 %702 }
 0x145   : > { %699 = vst.msk [vmem:[%s1474_s30 + $0x10] sm:$0xff] %vm698_vm14, %v696_v6 }
 0x146   : > { %706 = vst.msk [vmem:[%s1474_s30 + $0x10] sm:$0xff] %vm705_vm15, %v703_v7 }
 0x147   : > { %713 = vst.msk [vmem:[%s1474_s30 + $0x10] sm:$0xff] %vm712_vm0, %v710_v5 }
 0x148   : > { %1182 = shalt.err (!%p1179_p4)
}
 0x149   : > { %912 = dma.vmem_to_hbm [thread:$0]  (%p1387_p3), %s739_s14, 384, %s741_s20, %s720_s19  }
 0x14a PF: > { %s767_s13 = sand.u32 1, %s1217_s15   ;;  %p1638_p8 = scmp.ge.s32.totalorder %s1229_s18, 2 }
 0x14b   : > { %s768_s30 = scalar_lea.sflag [#allocation4], %s767_s13 }
 0x14c   : > { %p928_p9 = pnand %p1638_p8, %p1356_p6 }
 0x14e   : > { %p929_p2 = pneg %p928_p9 }
 0x150   : > { %1208 = dma.done.wait (%p929_p2), %s768_s30, 384  }
 0x151   : > { %1210 = vsyncadd (%p929_p2), %s768_s30, 4294966912  ;;  %s778_s27 = scalar_lea.sflag [#allocation10], %s767_s13 }
 0x152   : > { %1212 = dma.done.wait (%p929_p2), %s778_s27, 64  }
 0x153   : > { %1214 = vsyncadd (%p929_p2), %s778_s27, 4294967232  ;;  %p22_p3 = scmp.ge.s32.totalorder %s1377_s8, 4   ;;  %s1639_s15 = smov %s1221_s16 }
 0x154   : > { %s1640_s16 = smov %s1225_s17  ;;  %s1641_s17 = smov %s1393_s12 }
 0x155   : > { %s1642_s18 = smov %s1377_s8  ;;  %24 = sbr.rel (!%p22_p3) target bundleno = 8 (0x8), region = 102 }
 0x15a   :  { %784 = vsyncpa [#allocation3], 1 }
 0x15b   :  { %786 = vsyncpa [#allocation3 + $0x1], 1 }
 0x15c   :  { %787 = vsyncpa [#allocation6], 1 }
 0x15d   :  { %788 = vsyncpa [#allocation4], 1 }
 0x15e   :  { %790 = vsyncpa [#allocation4 + $0x1], 1 }
 0x15f   :  { %791 = vsyncpa [#allocation10], 1 }
 0x160   :  { %793 = vsyncpa [#allocation10 + $0x1], 1 }

</bundles_post_ra>
